<compile_context>
chip_gen: v5e
topology: v5e:2x2
jax: 0.10.0
libtpu: 0.0.40
codegen_flags: <defaults>
</compile_context>

<pallas_src>
import functools

import jax
import jax.numpy as jnp
from jax.experimental import pallas as pl
from jax.experimental.pallas import tpu as pltpu

LANES = 128


def _round_up(x, m):
    return (x + m - 1) // m * m


# ---------------------------------------------------------------------------
# Pallas kernel: per-(image, row-tile)  3x3-conv taps -> ReLU -> pooled sum
# ---------------------------------------------------------------------------
def _conv_gap_kernel(img_ref, w_ref, b_ref, o_ref, *, th, w, c, f_pad, inv_hw):
    # img_ref : (1, H+2, W+2, C) bf16  -- padded NHWC image (VMEM-resident per b)
    # w_ref   : (9, C, F_PAD)    bf16  -- conv weight, tap-major (t = dy*3 + dx)
    # b_ref   : (1, F_PAD)       f32   -- conv bias (zero-padded lanes)
    # o_ref   : (1, 1, F_PAD)    f32   -- accumulates pooled (mean) activations
    i = pl.program_id(1)
    n = pl.num_programs(1)

    @pl.when(i == 0)
    def _init():
        o_ref[...] = jnp.zeros_like(o_ref)

    row0 = pl.multiple_of(i * th, th)
    # Haloed row tile (TH+2, W+2, C).  Cast to f32 so the per-tap slices below
    # are plain (unpacked) sublane shifts; matmul operands are re-cast to bf16.
    xt = img_ref[0, pl.ds(row0, th + 2), :, :].astype(jnp.float32)

    # 3x3 conv as 9 accumulating (TH*W, C) x (C, F_PAD) matmuls (in-register
    # im2col), f32 accumulation.
    h = jnp.zeros((th * w, f_pad), jnp.float32)
    for t in range(9):
        dy, dx = divmod(t, 3)
        xs = xt[dy:dy + th, dx:dx + w, :].reshape(th * w, c)
        h = h + jnp.dot(xs.astype(jnp.bfloat16), w_ref[t],
                        preferred_element_type=jnp.float32)

    h = jnp.maximum(h + b_ref[...], 0.0)                  # bias + ReLU (lane-dense f32)
    o_ref[0] = o_ref[0] + jnp.sum(h, axis=0, keepdims=True)

    @pl.when(i == n - 1)
    def _finalize():
        o_ref[...] = o_ref[...] * inv_hw                  # sum -> mean over H*W


# ---------------------------------------------------------------------------
# Wrapper == WrappedModel.forward(images, targets)
# ---------------------------------------------------------------------------
def wrapped_model_forward(images_nchw, params, targets=None):
    """JAX/Pallas equivalent of WrappedModel.forward(images, targets).

    images_nchw: (B, C, H, W) float32 (PyTorch NCHW).  Returns (B, 6) pose.
    """
    del targets  # inference mode: targets unused (see TODO above)

    w_taps = params["w1_taps"]      # (9, C, F) f32, tap-major (t = dy*3 + dx)
    b1 = params["b1"]               # (F,)
    w2 = params["w2"]               # (F, 6)
    b2 = params["b2"]               # (6,)

    B, C, H, W = images_nchw.shape
    F = w_taps.shape[-1]
    F_PAD = _round_up(F, LANES)

    # Spatial row tile.  For detector-scale images pick TH so that TH*W is
    # roughly 512-2048 rows (measured HBM-roofline sweet spot); on v7x
    # (64 MiB VMEM/TC) use about half the v5e/v6e tile.  For the 16x16 toy,
    # TH=8 gives a 2-step reduction per image (grid has B*2 steps).
    th = max(d for d in (8, 4, 2, 1) if H % d == 0)
    n_tiles = H // th

    # Single layout pass: NCHW -> NHWC, 1-px spatial halo, bf16 (halves HBM
    # read traffic of the memory-bound kernel).  No im2col.
    x = jnp.transpose(images_nchw, (0, 2, 3, 1))
    x = jnp.pad(x, ((0, 0), (1, 1), (1, 1), (0, 0))).astype(jnp.bfloat16)

    # Pad conv width F to a full 128-lane tile (zero columns), bias likewise.
    w_p = jnp.pad(w_taps, ((0, 0), (0, 0), (0, F_PAD - F))).astype(jnp.bfloat16)
    b_p = jnp.pad(b1, (0, F_PAD - F)).reshape(1, F_PAD).astype(jnp.float32)

    kernel = functools.partial(_conv_gap_kernel, th=th, w=W, c=C,
                               f_pad=F_PAD, inv_hw=1.0 / (H * W))

    pooled = pl.pallas_call(
        kernel,
        out_shape=jax.ShapeDtypeStruct((B, 1, F_PAD), jnp.float32),
        grid_spec=pltpu.PrefetchScalarGridSpec(
            num_scalar_prefetch=0,
            grid=(B, n_tiles),                              # reduction axis last
            in_specs=[
                # Same image block for every row-tile -> stays VMEM-resident per b.
                pl.BlockSpec((1, H + 2, W + 2, C), lambda b, i: (b, 0, 0, 0)),
                pl.BlockSpec((9, C, F_PAD), lambda b, i: (0, 0, 0)),
                pl.BlockSpec((1, F_PAD), lambda b, i: (0, 0)),
            ],
            out_specs=pl.BlockSpec((1, 1, F_PAD), lambda b, i: (b, 0, 0)),
        ),
        compiler_params=pltpu.CompilerParams(
            dimension_semantics=("parallel", "arbitrary"),
        ),
    )(x, w_p, b_p)

    pooled = pooled.reshape(B, F_PAD)[:, :F]
    # Tiny 6-DoF pose head (M=B, N=6): once in XLA, outside the per-step MXU
    # path (avoids a 6-lane masked store every grid step).
    return pooled @ w2 + b2


# ---------------------------------------------------------------------------
# Parameters + pure-JAX reference (same bf16-input / f32-accumulate numerics)
# ---------------------------------------------------------------------------
def init_params(key, in_channels, hidden=32):
    """Deterministic synthetic parameters (no checkpoint loading).

    The conv weight is created in PyTorch OIHW layout (F, C, 3, 3) and repacked
    tap-major -> (9, C, F) with tap index t = dy*3 + dx, matching the kernel's
    in-register im2col.  Real img2pose checkpoints must apply this permutation.
    """
    k1, k2, k3, k4 = jax.random.split(key, 4)
    C, F = in_channels, hidden
    w_conv = jax.random.normal(k1, (F, C, 3, 3), jnp.float32) / jnp.sqrt(9.0 * C)
    w1_taps = jnp.transpose(w_conv, (2, 3, 1, 0)).reshape(9, C, F)
    b1 = jax.random.normal(k2, (F,), jnp.float32) * 0.01
    w2 = jax.random.normal(k3, (F, 6), jnp.float32) / jnp.sqrt(float(F))
    b2 = jax.random.normal(k4, (6,), jnp.float32) * 0.01
    return {"w1_taps": w1_taps, "b1": b1, "w2": w2, "b2": b2}


def _reference_forward(images_nchw, params):
    w_taps, b1, w2, b2 = (params["w1_taps"], params["b1"],
                          params["w2"], params["b2"])
    B, C, H, W = images_nchw.shape
    F = w_taps.shape[-1]
    x = jnp.transpose(images_nchw, (0, 2, 3, 1))
    xp = jnp.pad(x, ((0, 0), (1, 1), (1, 1), (0, 0))).astype(jnp.bfloat16)
    xp32 = xp.astype(jnp.float32)                      # same bf16 rounding as kernel
    wt32 = w_taps.astype(jnp.bfloat16).astype(jnp.float32)
    h = jnp.zeros((B, H, W, F), jnp.float32)
    for t in range(9):
        dy, dx = divmod(t, 3)
        h = h + jnp.einsum("bhwc,cf->bhwf", xp32[:, dy:dy + H, dx:dx + W, :], wt32[t])
    h = jnp.maximum(h + b1, 0.0)
    pooled = jnp.mean(h, axis=(1, 2))
    return pooled @ w2 + b2


if __name__ == "__main__":
    key = jax.random.PRNGKey(0)
    k_img, k_par = jax.random.split(key)

    B, C, H, W = 2, 4, 16, 16
    images = jax.random.normal(k_img, (B, C, H, W), jnp.float32)   # NCHW input
    params = init_params(k_par, in_channels=C, hidden=32)

    pose = wrapped_model_forward(images, params, targets=None)
    jax.block_until_ready(pose)

    assert pose.shape == (B, 6) and pose.dtype == jnp.float32

    ref = _reference_forward(images, params)
    max_err = float(jnp.max(jnp.abs(pose - ref)))
    assert jnp.allclose(pose, ref, atol=5e-2, rtol=5e-2), f"max abs err {max_err}"

    print("KERNEL_OK")
</pallas_src>

<mosaic_0001>
module attributes {stable_mosaic.version = 11 : i64} {
  func.func @_conv_gap_kernel(%arg0: i32, %arg1: i32, %arg2: memref<1x18x18x4xbf16, #tpu.memory_space<vmem>>, %arg3: memref<9x4x128xbf16, #tpu.memory_space<vmem>>, %arg4: memref<1x128xf32, #tpu.memory_space<vmem>>, %arg5: memref<1x1x128xf32, #tpu.memory_space<vmem>>) attributes {dimension_semantics = [#tpu.dimension_semantics<parallel>, #tpu.dimension_semantics<arbitrary>], iteration_bounds = array<i64: 2, 2>, scalar_prefetch = 0 : i64, scratch_operands = 0 : i64, tpu.core_type = #tpu.core_type<tc>, window_params = [{transform_indices = @transform_0, window_bounds = array<i64: 1, 18, 18, 4>}, {pipeline_mode = #tpu.pipeline_mode<synchronous>, transform_indices = @transform_1, window_bounds = array<i64: 9, 4, 128>}, {pipeline_mode = #tpu.pipeline_mode<synchronous>, transform_indices = @transform_2, window_bounds = array<i64: 1, 128>}, {transform_indices = @transform_3, window_bounds = array<i64: 1, 1, 128>}]} {
    %c0_i32 = arith.constant 0 : i32
    %0 = arith.cmpi eq, %arg1, %c0_i32 : i32
    %1 = arith.extui %0 : i1 to i32
    %c0_i32_0 = arith.constant 0 : i32
    %2 = arith.cmpi ne, %1, %c0_i32_0 : i32
    scf.if %2 {
      %cst_42 = arith.constant 0.000000e+00 : f32
      %89 = vector.broadcast %cst_42 : f32 to vector<1x1x128xf32>
      %c0_43 = arith.constant 0 : index
      %c0_44 = arith.constant 0 : index
      %c0_45 = arith.constant 0 : index
      %90 = vector.load %arg5[%c0_43, %c0_44, %c0_45] : memref<1x1x128xf32, #tpu.memory_space<vmem>>, vector<1x1x128xf32>
      tpu.vector_store %arg5[%c0_43, %c0_44, %c0_45], %89 {strides = array<i32>} : memref<1x1x128xf32, #tpu.memory_space<vmem>>, vector<1x1x128xf32>,
    } else {
    }
    %c8_i32 = arith.constant 8 : i32
    %3 = arith.muli %arg1, %c8_i32 : i32
    %4 = tpu.assume_multiple %3, 8 : i32
    %c0 = arith.constant 0 : index
    %5 = arith.index_cast %4 : i32 to index
    %c0_1 = arith.constant 0 : index
    %c0_2 = arith.constant 0 : index
    %6 = vector.load %arg2[%c0, %5, %c0_1, %c0_2] : memref<1x18x18x4xbf16, #tpu.memory_space<vmem>>, vector<1x10x18x4xbf16>
    %7 = vector.shape_cast %6 : vector<1x10x18x4xbf16> to vector<10x18x4xbf16>
    %8 = arith.extf %7 : vector<10x18x4xbf16> to vector<10x18x4xf32>
    %cst = arith.constant 0.000000e+00 : f32
    %9 = vector.broadcast %cst : f32 to vector<128x128xf32>
    %10 = vector.extract_strided_slice %8 {offsets = [0, 0, 0], sizes = [8, 16, 4], strides = [1, 1, 1]} : vector<10x18x4xf32> to vector<8x16x4xf32>
    %11 = vector.shape_cast %10 : vector<8x16x4xf32> to vector<128x4xf32>
    %12 = arith.truncf %11 : vector<128x4xf32> to vector<128x4xbf16>
    %c0_3 = arith.constant 0 : index
    %c0_4 = arith.constant 0 : index
    %c0_5 = arith.constant 0 : index
    %13 = vector.load %arg3[%c0_3, %c0_4, %c0_5] : memref<9x4x128xbf16, #tpu.memory_space<vmem>>, vector<1x4x128xbf16>
    %14 = vector.shape_cast %13 : vector<1x4x128xbf16> to vector<4x128xbf16>
    %cst_6 = arith.constant dense<0.000000e+00> : vector<128x128xf32>
    %15 = tpu.matmul %12, %14, %cst_6 {dimension_numbers = #tpu.dot_dimension_numbers<[1], [0], [0], [1], [0, 0, 1, 1], [], []>} : vector<128x4xbf16>, vector<4x128xbf16>, vector<128x128xf32> -> vector<128x128xf32>
    %16 = arith.addf %9, %15 : vector<128x128xf32>
    %17 = vector.extract_strided_slice %8 {offsets = [0, 1, 0], sizes = [8, 16, 4], strides = [1, 1, 1]} : vector<10x18x4xf32> to vector<8x16x4xf32>
    %18 = vector.shape_cast %17 : vector<8x16x4xf32> to vector<128x4xf32>
    %19 = arith.truncf %18 : vector<128x4xf32> to vector<128x4xbf16>
    %c1 = arith.constant 1 : index
    %c0_7 = arith.constant 0 : index
    %c0_8 = arith.constant 0 : index
    %20 = vector.load %arg3[%c1, %c0_7, %c0_8] : memref<9x4x128xbf16, #tpu.memory_space<vmem>>, vector<1x4x128xbf16>
    %21 = vector.shape_cast %20 : vector<1x4x128xbf16> to vector<4x128xbf16>
    %cst_9 = arith.constant dense<0.000000e+00> : vector<128x128xf32>
    %22 = tpu.matmul %19, %21, %cst_9 {dimension_numbers = #tpu.dot_dimension_numbers<[1], [0], [0], [1], [0, 0, 1, 1], [], []>} : vector<128x4xbf16>, vector<4x128xbf16>, vector<128x128xf32> -> vector<128x128xf32>
    %23 = arith.addf %16, %22 : vector<128x128xf32>
    %24 = vector.extract_strided_slice %8 {offsets = [0, 2, 0], sizes = [8, 16, 4], strides = [1, 1, 1]} : vector<10x18x4xf32> to vector<8x16x4xf32>
    %25 = vector.shape_cast %24 : vector<8x16x4xf32> to vector<128x4xf32>
    %26 = arith.truncf %25 : vector<128x4xf32> to vector<128x4xbf16>
    %c2 = arith.constant 2 : index
    %c0_10 = arith.constant 0 : index
    %c0_11 = arith.constant 0 : index
    %27 = vector.load %arg3[%c2, %c0_10, %c0_11] : memref<9x4x128xbf16, #tpu.memory_space<vmem>>, vector<1x4x128xbf16>
    %28 = vector.shape_cast %27 : vector<1x4x128xbf16> to vector<4x128xbf16>
    %cst_12 = arith.constant dense<0.000000e+00> : vector<128x128xf32>
    %29 = tpu.matmul %26, %28, %cst_12 {dimension_numbers = #tpu.dot_dimension_numbers<[1], [0], [0], [1], [0, 0, 1, 1], [], []>} : vector<128x4xbf16>, vector<4x128xbf16>, vector<128x128xf32> -> vector<128x128xf32>
    %30 = arith.addf %23, %29 : vector<128x128xf32>
    %31 = vector.extract_strided_slice %8 {offsets = [1, 0, 0], sizes = [8, 16, 4], strides = [1, 1, 1]} : vector<10x18x4xf32> to vector<8x16x4xf32>
    %32 = vector.shape_cast %31 : vector<8x16x4xf32> to vector<128x4xf32>
    %33 = arith.truncf %32 : vector<128x4xf32> to vector<128x4xbf16>
    %c3 = arith.constant 3 : index
    %c0_13 = arith.constant 0 : index
    %c0_14 = arith.constant 0 : index
    %34 = vector.load %arg3[%c3, %c0_13, %c0_14] : memref<9x4x128xbf16, #tpu.memory_space<vmem>>, vector<1x4x128xbf16>
    %35 = vector.shape_cast %34 : vector<1x4x128xbf16> to vector<4x128xbf16>
    %cst_15 = arith.constant dense<0.000000e+00> : vector<128x128xf32>
    %36 = tpu.matmul %33, %35, %cst_15 {dimension_numbers = #tpu.dot_dimension_numbers<[1], [0], [0], [1], [0, 0, 1, 1], [], []>} : vector<128x4xbf16>, vector<4x128xbf16>, vector<128x128xf32> -> vector<128x128xf32>
    %37 = arith.addf %30, %36 : vector<128x128xf32>
    %38 = vector.extract_strided_slice %8 {offsets = [1, 1, 0], sizes = [8, 16, 4], strides = [1, 1, 1]} : vector<10x18x4xf32> to vector<8x16x4xf32>
    %39 = vector.shape_cast %38 : vector<8x16x4xf32> to vector<128x4xf32>
    %40 = arith.truncf %39 : vector<128x4xf32> to vector<128x4xbf16>
    %c4 = arith.constant 4 : index
    %c0_16 = arith.constant 0 : index
    %c0_17 = arith.constant 0 : index
    %41 = vector.load %arg3[%c4, %c0_16, %c0_17] : memref<9x4x128xbf16, #tpu.memory_space<vmem>>, vector<1x4x128xbf16>
    %42 = vector.shape_cast %41 : vector<1x4x128xbf16> to vector<4x128xbf16>
    %cst_18 = arith.constant dense<0.000000e+00> : vector<128x128xf32>
    %43 = tpu.matmul %40, %42, %cst_18 {dimension_numbers = #tpu.dot_dimension_numbers<[1], [0], [0], [1], [0, 0, 1, 1], [], []>} : vector<128x4xbf16>, vector<4x128xbf16>, vector<128x128xf32> -> vector<128x128xf32>
    %44 = arith.addf %37, %43 : vector<128x128xf32>
    %45 = vector.extract_strided_slice %8 {offsets = [1, 2, 0], sizes = [8, 16, 4], strides = [1, 1, 1]} : vector<10x18x4xf32> to vector<8x16x4xf32>
    %46 = vector.shape_cast %45 : vector<8x16x4xf32> to vector<128x4xf32>
    %47 = arith.truncf %46 : vector<128x4xf32> to vector<128x4xbf16>
    %c5 = arith.constant 5 : index
    %c0_19 = arith.constant 0 : index
    %c0_20 = arith.constant 0 : index
    %48 = vector.load %arg3[%c5, %c0_19, %c0_20] : memref<9x4x128xbf16, #tpu.memory_space<vmem>>, vector<1x4x128xbf16>
    %49 = vector.shape_cast %48 : vector<1x4x128xbf16> to vector<4x128xbf16>
    %cst_21 = arith.constant dense<0.000000e+00> : vector<128x128xf32>
    %50 = tpu.matmul %47, %49, %cst_21 {dimension_numbers = #tpu.dot_dimension_numbers<[1], [0], [0], [1], [0, 0, 1, 1], [], []>} : vector<128x4xbf16>, vector<4x128xbf16>, vector<128x128xf32> -> vector<128x128xf32>
    %51 = arith.addf %44, %50 : vector<128x128xf32>
    %52 = vector.extract_strided_slice %8 {offsets = [2, 0, 0], sizes = [8, 16, 4], strides = [1, 1, 1]} : vector<10x18x4xf32> to vector<8x16x4xf32>
    %53 = vector.shape_cast %52 : vector<8x16x4xf32> to vector<128x4xf32>
    %54 = arith.truncf %53 : vector<128x4xf32> to vector<128x4xbf16>
    %c6 = arith.constant 6 : index
    %c0_22 = arith.constant 0 : index
    %c0_23 = arith.constant 0 : index
    %55 = vector.load %arg3[%c6, %c0_22, %c0_23] : memref<9x4x128xbf16, #tpu.memory_space<vmem>>, vector<1x4x128xbf16>
    %56 = vector.shape_cast %55 : vector<1x4x128xbf16> to vector<4x128xbf16>
    %cst_24 = arith.constant dense<0.000000e+00> : vector<128x128xf32>
    %57 = tpu.matmul %54, %56, %cst_24 {dimension_numbers = #tpu.dot_dimension_numbers<[1], [0], [0], [1], [0, 0, 1, 1], [], []>} : vector<128x4xbf16>, vector<4x128xbf16>, vector<128x128xf32> -> vector<128x128xf32>
    %58 = arith.addf %51, %57 : vector<128x128xf32>
    %59 = vector.extract_strided_slice %8 {offsets = [2, 1, 0], sizes = [8, 16, 4], strides = [1, 1, 1]} : vector<10x18x4xf32> to vector<8x16x4xf32>
    %60 = vector.shape_cast %59 : vector<8x16x4xf32> to vector<128x4xf32>
    %61 = arith.truncf %60 : vector<128x4xf32> to vector<128x4xbf16>
    %c7 = arith.constant 7 : index
    %c0_25 = arith.constant 0 : index
    %c0_26 = arith.constant 0 : index
    %62 = vector.load %arg3[%c7, %c0_25, %c0_26] : memref<9x4x128xbf16, #tpu.memory_space<vmem>>, vector<1x4x128xbf16>
    %63 = vector.shape_cast %62 : vector<1x4x128xbf16> to vector<4x128xbf16>
    %cst_27 = arith.constant dense<0.000000e+00> : vector<128x128xf32>
    %64 = tpu.matmul %61, %63, %cst_27 {dimension_numbers = #tpu.dot_dimension_numbers<[1], [0], [0], [1], [0, 0, 1, 1], [], []>} : vector<128x4xbf16>, vector<4x128xbf16>, vector<128x128xf32> -> vector<128x128xf32>
    %65 = arith.addf %58, %64 : vector<128x128xf32>
    %66 = vector.extract_strided_slice %8 {offsets = [2, 2, 0], sizes = [8, 16, 4], strides = [1, 1, 1]} : vector<10x18x4xf32> to vector<8x16x4xf32>
    %67 = vector.shape_cast %66 : vector<8x16x4xf32> to vector<128x4xf32>
    %68 = arith.truncf %67 : vector<128x4xf32> to vector<128x4xbf16>
    %c8 = arith.constant 8 : index
    %c0_28 = arith.constant 0 : index
    %c0_29 = arith.constant 0 : index
    %69 = vector.load %arg3[%c8, %c0_28, %c0_29] : memref<9x4x128xbf16, #tpu.memory_space<vmem>>, vector<1x4x128xbf16>
    %70 = vector.shape_cast %69 : vector<1x4x128xbf16> to vector<4x128xbf16>
    %cst_30 = arith.constant dense<0.000000e+00> : vector<128x128xf32>
    %71 = tpu.matmul %68, %70, %cst_30 {dimension_numbers = #tpu.dot_dimension_numbers<[1], [0], [0], [1], [0, 0, 1, 1], [], []>} : vector<128x4xbf16>, vector<4x128xbf16>, vector<128x128xf32> -> vector<128x128xf32>
    %72 = arith.addf %65, %71 : vector<128x128xf32>
    %c0_31 = arith.constant 0 : index
    %c0_32 = arith.constant 0 : index
    %73 = vector.load %arg4[%c0_31, %c0_32] : memref<1x128xf32, #tpu.memory_space<vmem>>, vector<1x128xf32>
    %74 = vector.broadcast %73 : vector<1x128xf32> to vector<128x128xf32>
    %75 = arith.addf %72, %74 : vector<128x128xf32>
    %cst_33 = arith.constant 0.000000e+00 : f32
    %76 = vector.broadcast %cst_33 : f32 to vector<128x128xf32>
    %77 = arith.maximumf %75, %76 : vector<128x128xf32>
    %c0_34 = arith.constant 0 : index
    %c0_35 = arith.constant 0 : index
    %c0_36 = arith.constant 0 : index
    %78 = vector.load %arg5[%c0_34, %c0_35, %c0_36] : memref<1x1x128xf32, #tpu.memory_space<vmem>>, vector<1x1x128xf32>
    %79 = vector.shape_cast %78 : vector<1x1x128xf32> to vector<1x128xf32>
    %cst_37 = arith.constant dense<0.000000e+00> : vector<128xf32>
    %80 = vector.multi_reduction <add>, %77, %cst_37 [0] : vector<128x128xf32> to vector<128xf32>
    %81 = vector.shape_cast %80 : vector<128xf32> to vector<1x128xf32>
    %82 = arith.addf %79, %81 : vector<1x128xf32>
    %c0_38 = arith.constant 0 : index
    %c0_39 = arith.constant 0 : index
    %c0_40 = arith.constant 0 : index
    %83 = vector.load %arg5[%c0_38, %c0_39, %c0_40] : memref<1x1x128xf32, #tpu.memory_space<vmem>>, vector<1x1x128xf32>
    %84 = vector.shape_cast %83 : vector<1x1x128xf32> to vector<1x128xf32>
    %85 = vector.shape_cast %82 : vector<1x128xf32> to vector<1x1x128xf32>
    tpu.vector_store %arg5[%c0_38, %c0_39, %c0_40], %85 {strides = array<i32>} : memref<1x1x128xf32, #tpu.memory_space<vmem>>, vector<1x1x128xf32>,
    %c1_i32 = arith.constant 1 : i32
    %86 = arith.cmpi eq, %arg1, %c1_i32 : i32
    %87 = arith.extui %86 : i1 to i32
    %c0_i32_41 = arith.constant 0 : i32
    %88 = arith.cmpi ne, %87, %c0_i32_41 : i32
    scf.if %88 {
      %c0_42 = arith.constant 0 : index
      %c0_43 = arith.constant 0 : index
      %c0_44 = arith.constant 0 : index
      %89 = vector.load %arg5[%c0_42, %c0_43, %c0_44] : memref<1x1x128xf32, #tpu.memory_space<vmem>>, vector<1x1x128xf32>
      %cst_45 = arith.constant 3.906250e-03 : f32
      %90 = vector.broadcast %cst_45 : f32 to vector<1x1x128xf32>
      %91 = arith.mulf %89, %90 : vector<1x1x128xf32>
      %c0_46 = arith.constant 0 : index
      %c0_47 = arith.constant 0 : index
      %c0_48 = arith.constant 0 : index
      %92 = vector.load %arg5[%c0_46, %c0_47, %c0_48] : memref<1x1x128xf32, #tpu.memory_space<vmem>>, vector<1x1x128xf32>
      tpu.vector_store %arg5[%c0_46, %c0_47, %c0_48], %91 {strides = array<i32>} : memref<1x1x128xf32, #tpu.memory_space<vmem>>, vector<1x1x128xf32>,
    } else {
    }
    return
  }
  func.func @transform_0(%arg0: i32, %arg1: i32) -> (i32, i32, i32, i32) {
    %c0_i32 = arith.constant 0 : i32
    %c0_i32_0 = arith.constant 0 : i32
    %c0_i32_1 = arith.constant 0 : i32
    %c0_i32_2 = arith.constant 0 : i32
    return %arg0, %c0_i32, %c0_i32_0, %c0_i32_1 : i32, i32, i32, i32
  }
  func.func @transform_1(%arg0: i32, %arg1: i32) -> (i32, i32, i32) {
    %c0_i32 = arith.constant 0 : i32
    %c0_i32_0 = arith.constant 0 : i32
    %c0_i32_1 = arith.constant 0 : i32
    %c0_i32_2 = arith.constant 0 : i32
    return %c0_i32, %c0_i32_0, %c0_i32_1 : i32, i32, i32
  }
  func.func @transform_2(%arg0: i32, %arg1: i32) -> (i32, i32) {
    %c0_i32 = arith.constant 0 : i32
    %c0_i32_0 = arith.constant 0 : i32
    %c0_i32_1 = arith.constant 0 : i32
    return %c0_i32, %c0_i32_0 : i32, i32
  }
  func.func @transform_3(%arg0: i32, %arg1: i32) -> (i32, i32, i32) {
    %c0_i32 = arith.constant 0 : i32
    %c0_i32_0 = arith.constant 0 : i32
    %c0_i32_1 = arith.constant 0 : i32
    return %arg0, %c0_i32, %c0_i32_0 : i32, i32, i32
  }
}

</mosaic_0001>

<bundles_post_ra>
// kernel: tpu_custom_call.1
= control target key start
LH: loop header
LB: loop body
LE: loop exit
PB: predicated region body
PF: predicated region fallthrough
CT: control target
= control target key end

     0   :  { %8 = vsyncpa [#allocation3], 0  ;;  %s2259_s0 = inlined_call_operand.vmem [shape: bf16[2,18,18,4], index: 0, kind: input, shape index: {}]   ;;  %s2260_s1 = inlined_call_operand.vmem [shape: bf16[9,4,128], index: 1, kind: input, shape index: {}]   ;;  %s2261_s2 = inlined_call_operand.vmem [shape: f32[1,128], index: 2, kind: input, shape index: {}]   ;;  %s2262_s3 = inlined_call_operand.hbm [shape: f32[2,1,128], index: 3, kind: output, shape index: {}]  }
   0x1   :  { %10 = vsyncpa [#allocation3 + $0x1], 0  ;;  %s1601_s12 = smov 0   ;;  %s1603_s13 = smov 0  }
   0x2   :  { %s1605_s14 = smov 0   ;;  %s1607_s15 = smov 0  }
   0x3   :  { %s1609_s16 = smov 0   ;;  %s1611_s17 = smov 0  }
   0x4   :  { %s1613_s18 = smov 0   ;;  %s1615_s19 = smov 0  }
   0x5 LB: > { %s1289_s20 = sadd.s32 4294967295, %s1578_s19   ;;  %s1290_s21 = sadd.s32 4294967294, %s1578_s19   ;;  %s1578_s19 = sphi %s1615_s19, %s16_s19   ;;  %s1574_s18 = sphi %s1613_s18, %s2273_s18   ;;  %s1570_s17 = sphi %s1611_s17, %s2272_s17   ;;  %s1566_s16 = sphi %s1609_s16, %s2271_s16   ;;  %s1562_s15 = sphi %s1607_s15, %s2270_s15   ;;  %s1558_s14 = sphi %s1605_s14, %s2269_s14   ;;  %s1554_s13 = sphi %s1603_s13, %s2268_s13   ;;  %s1550_s12 = sphi %s1601_s12, %s2267_s12  }
   0x6   : > { %s25_s22 = sadd.s32 1, %s1570_s17  ;;  %s28_s23 = sadd.s32 1, %s1574_s18 }
   0x7   : > { %p26_p0 = scmp.ge.s32.totalorder %s25_s22, 2  ;;  %p113_p1 = scmp.ne.s32.totalorder %s1558_s14, %s1554_s13 }
   0x8   : > { %p114_p2 = scmp.eq.s32.totalorder %s1289_s20, 3  ;;  %p119_p4 = scmp.ne.s32.totalorder %s1554_s13, %s1550_s12 }
   0x9   : > { %s2275_s22 = smov (%p26_p0, %s25_s22), 0  ;;  %s2277_s23 = smov (!%p26_p0, %s28_s23), %s1574_s18 }
   0xa   : > { %p1650_p3 = por %p114_p2, %p113_p1  ;;  %p30_p5 = scmp.ge.s32.totalorder %s2277_s23, 2 }
   0xb   : > { %p120_p6 = scmp.eq.s32.totalorder %s1290_s21, 3  ;;  %p1293_p7 = scmp.ge.s32.totalorder %s1578_s19, 1 }
   0xc   : > { %p152_p8 = scmp.lt.s32.totalorder %s1578_s19, 5  ;;  %s2279_s23 = smov (%p30_p5, %s2277_s23), 0 }
   0xd   : > { %p1660_p9 = por %p120_p6, %p119_p4  ;;  %s100_s26 = ssub.s32 %s1574_s18, %s2279_s23 }
   0xe   : > { %p153_p10 = pnand %p1293_p7, %p152_p8  ;;  %s103_s27 = sadd.s32 1, %s1558_s14 }
   0xf   : > { %p101_p11 = scmp.eq.s32.totalorder %s100_s26, 0  ;;  %s173_s29 = sand.u32 (!%p153_p10), 1, %s1554_s13  }
  0x10   : > { %156 = sbr.rel (%p153_p10) target bundleno = 504 (0x1f8), region = 32  ;;  %p175_p12 = scmp.lt.s32.totalorder (!%p153_p10), %s1566_s16, 1 }
  0x11   : > { %s1668_s28 = scalar_select %p101_p11, %s1558_s14, %s103_s27  }
  0x12   : > { %s1678_s8 = scalar_lea.vmem (!%p153_p10), [#allocation2], %s173_s29  ;;  %p1295_p13 = scmp.ne.s32.totalorder (!%p153_p10), %s1562_s15, 0 }
  0x15   : > { %s176_s30 = scalar_select %p175_p12, %s1566_s16, 1 }
  0x16   : > { %184 = sbr.rel (%p1295_p13) target bundleno = 29 (0x1d), region = 36 }
  0x17   : > { %s1410_s4 = smul.u32 216, %s176_s30 }
  0x19   : > { %s179_s7 = scalar_lea.vmem %s2259_s0, %s1410_s4 }
  0x1b   : > { %v1580_v0 = vmov 0.0  }
  0x1c   : > { %185 = vst [vmem:[%s1678_s8] sm:$0x1] %v1580_v0 }
  0x1d PF: > { %v1299_v1 = vld [vmem:[%s2260_s1 + $0x2] sm:$0x3]  ;;  %vm375_vm0 = vcmask 1041408   ;;  %s1382_s11 = smul.u32 96, %s1562_s15  ;;  %vm283_vm1 = vcmask 1046528   ;;  %vm350_vm2 = vcmask 31744  }
  0x1e   : > { %v377_v2 = vsel %vm375_vm0, %v1299_v1, 0  ;;  %v1316_v3 = vld [vmem:[%s2260_s1 + $0x4] sm:$0x3]  ;;  %v1325_v4 = vld [vmem:[%s2260_s1 + $0x6] sm:$0x3]  ;;  %vm504_vm3 = vcmask 1045504  }
  0x1f   : > { %1407 = vmatpush.bf16.msra.mxu1 %v377_v2  ;;  %1408 = vmatpush.bf16.msra.mxu2 %v377_v2  ;;  %s1693_s30 = scalar_lea.vmem %s179_s7, %s1382_s11  ;;  %v596_v5 = vsel %vm375_vm0, %v1316_v3, 0  ;;  %v670_v6 = vsel %vm375_vm0, %v1325_v4, 0  ;;  %v258_v7 = vld [vmem:[%s2260_s1] sm:$0x3]  ;;  %v1334_v8 = vld [vmem:[%s2260_s1 + $0x8] sm:$0x3] }
  0x20   : > { %1409 = vmatpush.bf16.msra.mxu3 %v377_v2  ;;  %386 = vmatpush.bf16.msra.mxu0 %v377_v2  ;;  %v1704_v9 = vld [vmem:[%s1693_s30 + $0x18] sm:$0xff]   ;;  %v1707_v10 = vld [vmem:[%s1693_s30 + $0x20] sm:$0x1]  ;;  %v1710_v11 = vld [vmem:[%s1693_s30 + $0x30] sm:$0xff]   ;;  %v453_v12 = vsel %vm375_vm0, %v258_v7, 0  ;;  %v754_v13 = vsel %vm375_vm0, %v1334_v8, 0 }
  0x21   : > { %v1389_v14 = vunpack.c.l.bf16 %v1704_v9  ;;  %v1390_v15 = vunpack.c.h.bf16 %v1704_v9  ;;  %v228_v16 = vunpack.c.l.bf16 %v1707_v10  ;;  %v1393_v17 = vunpack.c.l.bf16 %v1710_v11  ;;  %v1719_v18 = vld [vmem:[%s1693_s30 + $0x38] sm:$0x1]  ;;  %v1722_v19 = vld [vmem:[%s1693_s30 + $0x48] sm:$0xff]   ;;  %v1725_v20 = vld [vmem:[%s1693_s30 + $0x50] sm:$0x1]  ;;  %p1379_p0 = scmp.ne.s32.totalorder %s1562_s15, 1 }
  0x22   : > { %v1394_v21 = vunpack.c.h.bf16 %v1710_v11  ;;  %v234_v22 = vunpack.c.l.bf16 %v1719_v18  ;;  %v1397_v23 = vunpack.c.l.bf16 %v1722_v19  ;;  %v1398_v24 = vunpack.c.h.bf16 %v1722_v19  ;;  %v1732_v25 = vld [vmem:[%s1693_s30] sm:$0xff]   ;;  %v1750_v34 = vld [vmem:[%s1693_s30 + $0x8] sm:$0x1]  ;;  %v1767_v44 = vld [vmem:[%s1693_s30 + $0x2c] sm:$0x1] }
  0x23   : > { %605 = vmatpush.bf16.msrb.mxu2 %v596_v5  ;;  %462 = vmatpush.bf16.msrb.mxu1 %v453_v12  ;;  %v294_v26 = vrot.slane %v1389_v14, 1  ;;  %v295_v27 = vrot.slane %v1390_v15, 1  ;;  %v297_v28 = vrot.slane %v228_v16, 1  ;;  %v304_v29 = vrot.slane %v1393_v17, 1  ;;  %v1758_v39 = vld [vmem:[%s1693_s30 + $0x24] sm:$0xff]   ;;  %v1775_v49 = vld [vmem:[%s1693_s30 + $0x3c] sm:$0xff]  }
  0x24   : > { %679 = vmatpush.bf16.msrb.mxu3 %v670_v6  ;;  %763 = vmatpush.bf16.msrb.mxu0 %v754_v13  ;;  %v305_v30 = vrot.slane %v1394_v21, 1  ;;  %v307_v31 = vrot.slane %v234_v22, 1  ;;  %v240_v32 = vunpack.c.l.bf16 %v1725_v20  ;;  %v314_v33 = vrot.slane %v1397_v23, 1  ;;  %v1785_v54 = vld [vmem:[%s1693_s30 + $0x44] sm:$0x1]  ;;  %v1799_v61 = vld [vmem:[%s1693_s30 + $0x54] sm:$0xff]  }
  0x25   : > { %v296_v35 = vsel %vm283_vm1, %v294_v26, %v295_v27  ;;  %v298_v36 = vsel %vm283_vm1, %v295_v27, %v297_v28  ;;  %v315_v37 = vrot.slane %v1398_v24, 1  ;;  %v1385_v38 = vunpack.c.l.bf16 %v1732_v25  ;;  %v1807_v1 = vld [vmem:[%s1693_s30 + $0x5c] sm:$0x1]  ;;  %v1812_v4 = vld [vmem:[%s1693_s30 + $0xc] sm:$0xff]   ;;  %v195_v12 = vld [vmem:[%s1693_s30 + $0x14] sm:$0x1] }
  0x26   : > { %v1760_v40 = vpack.c.bf16 %v298_v36, %v296_v35  ;;  %v306_v41 = vsel %vm283_vm1, %v304_v29, %v305_v30  ;;  %v308_v42 = vsel %vm283_vm1, %v305_v30, %v307_v31  ;;  %v317_v43 = vrot.slane %v240_v32, 1 }
  0x27   : > { %v1769_v45 = vpack.c.bf16 %v308_v42, %v306_v41  ;;  %v316_v46 = vsel %vm283_vm1, %v314_v33, %v315_v37  ;;  %v1386_v47 = vunpack.c.h.bf16 %v1732_v25  ;;  %v222_v48 = vunpack.c.l.bf16 %v1750_v34 }
  0x28   : > { %1302 = vmatmul.msk.bf16.vlgmr.msra.gmra.mxu1 %vm350_vm2, %v1760_v40  ;;  %v318_v50 = vsel %vm283_vm1, %v315_v37, %v317_v43  ;;  %v284_v51 = vrot.slane %v1385_v38, 1  ;;  %v229_v52 = vunpack.c.l.bf16 %v1758_v39  ;;  %v230_v53 = vunpack.c.h.bf16 %v1758_v39  ;;  %v1352_v37 = vld [vmem:[%s2260_s1 + $0xc] sm:$0x3]  ;;  %v1361_v43 = vld [vmem:[%s2260_s1 + $0xe] sm:$0x3] }
  0x29   : > { %1304 = vmatmul.msk.bf16.vlgmr.msra.gmra.mxu2 %vm350_vm2, %v1769_v45  ;;  %v1789_v55 = vpack.c.bf16 %v318_v50, %v316_v46  ;;  %v285_v56 = vrot.slane %v1386_v47, 1  ;;  %v287_v57 = vrot.slane %v222_v48, 1  ;;  %v231_v58 = vunpack.c.l.bf16 %v1767_v44 }
  0x2a   : > { %v235_v59 = vunpack.c.l.bf16 %v1775_v49  ;;  %v236_v60 = vunpack.c.h.bf16 %v1775_v49  ;;  %v237_v0 = vunpack.c.l.bf16 %v1785_v54  ;;  %v299_v3 = vrot.slane %v229_v52, 1 }
  0x2b   : > { %1306 = vmatmul.msk.bf16.vlgmr.msra.gmra.mxu3 %vm350_vm2, %v1789_v55  ;;  %v286_v62 = vsel %vm283_vm1, %v284_v51, %v285_v56  ;;  %v288_v63 = vsel %vm283_vm1, %v285_v56, %v287_v57  ;;  %v300_v5 = vrot.slane %v230_v53, 1  ;;  %v302_v6 = vrot.slane %v231_v58, 1  ;;  %v1343_v51 = vld [vmem:[%s2260_s1 + $0xa] sm:$0x3]  ;;  %v1370_v56 = vld [vmem:[%s2260_s1 + $0x10] sm:$0x3] }
  0x2c   : > { %v340_v2 = vpack.c.bf16 %v288_v63, %v286_v62  ;;  %v241_v7 = vunpack.c.l.bf16 %v1799_v61  ;;  %v242_v8 = vunpack.c.h.bf16 %v1799_v61  ;;  %v309_v13 = vrot.slane %v235_v59, 1 }
  0x2d   : > { %v310_v26 = vrot.slane %v236_v60, 1  ;;  %v312_v27 = vrot.slane %v237_v0, 1  ;;  %v2263_v28 = vunpack.c.l.bf16 %v1807_v1  ;;  %v223_v29 = vunpack.c.l.bf16 %v1812_v4 }
  0x2e   : > { %1300 = vmatmul.msk.bf16.vlgmr.msra.gmra.mxu0 %vm350_vm2, %v340_v2  ;;  %v224_v30 = vunpack.c.h.bf16 %v1812_v4  ;;  %v319_v31 = vrot.slane %v241_v7, 1  ;;  %v320_v33 = vrot.slane %v242_v8, 1  ;;  %v225_v36 = vunpack.c.l.bf16 %v195_v12 }
  0x2f   : > { %v322_v35 = vrot.slane %v2263_v28, 1  ;;  %v301_v41 = vsel %vm283_vm1, %v299_v3, %v300_v5  ;;  %v303_v42 = vsel %vm283_vm1, %v300_v5, %v302_v6  ;;  %v311_v46 = vsel %vm283_vm1, %v309_v13, %v310_v26 }
  0x30   : > { %v313_v50 = vsel %vm283_vm1, %v310_v26, %v312_v27  ;;  %v289_v57 = vrot.slane %v223_v29, 1  ;;  %v290_v62 = vrot.slane %v224_v30, 1  ;;  %v292_v63 = vrot.slane %v225_v36, 1 }
  0x31   : > { %v909_v2 = vsel %vm375_vm0, %v1352_v37, 0  ;;  %v1854_v3 = vpack.c.bf16 %v303_v42, %v301_v41  ;;  %v321_v5 = vsel %vm283_vm1, %v319_v31, %v320_v33  ;;  %v323_v6 = vsel %vm283_vm1, %v320_v33, %v322_v35 }
  0x32   : > { %918 = vmatpush.bf16.msra.mxu2 %v909_v2  ;;  %v993_v12 = vsel %vm375_vm0, %v1361_v43, 0  ;;  %v1859_v13 = vpack.c.bf16 %v313_v50, %v311_v46  ;;  %v835_v26 = vsel %vm375_vm0, %v1343_v51, 0  ;;  %v1074_v27 = vsel %vm375_vm0, %v1370_v56, 0 }
  0x33   : > { %1002 = vmatpush.bf16.msra.mxu3 %v993_v12  ;;  %844 = vmatpush.bf16.msra.mxu1 %v835_v26  ;;  %v1863_v28 = vpack.c.bf16 %v323_v6, %v321_v5  ;;  %v291_v37 = vsel %vm283_vm1, %v289_v57, %v290_v62  ;;  %v293_v31 = vsel %vm283_vm1, %v290_v62, %v292_v63  ;;  %v505_v35 = vrot.slane %v1385_v38, 2 }
  0x34   : > { %1083 = vmatpush.bf16.msra.mxu0 %v1074_v27  ;;  %v341_v33 = vpack.c.bf16 %v293_v31, %v291_v37  ;;  %v506_v41 = vrot.slane %v1386_v47, 2  ;;  %v508_v42 = vrot.slane %v222_v48, 2  ;;  %v515_v51 = vrot.slane %v1389_v14, 2 }
  0x35   : > { %v516_v56 = vrot.slane %v1390_v15, 2  ;;  %v518_v38 = vrot.slane %v228_v16, 2  ;;  %v510_v14 = vrot.slane %v223_v29, 2  ;;  %v511_v15 = vrot.slane %v224_v30, 2 }
  0x36   : > { %v507_v43 = vsel %vm504_vm3, %v505_v35, %v506_v41  ;;  %v509_v46 = vsel %vm504_vm3, %v506_v41, %v508_v42  ;;  %v513_v10 = vrot.slane %v225_v36, 2  ;;  %v520_v62 = vrot.slane %v229_v52, 2 }
  0x37   : > { %v561_v50 = vpack.c.bf16 %v509_v46, %v507_v43  ;;  %v517_v34 = vsel %vm504_vm3, %v515_v51, %v516_v56  ;;  %v519_v47 = vsel %vm504_vm3, %v516_v56, %v518_v38  ;;  %v512_v16 = vsel %vm504_vm3, %v510_v14, %v511_v15 }
  0x38   : > { %1303 = vmatmul.msk.bf16.gmra.mxu1 %vm350_vm2, %v1854_v3  ;;  %v1893_v48 = vpack.c.bf16 %v519_v47, %v517_v34  ;;  %v521_v63 = vrot.slane %v230_v53, 2  ;;  %v523_v2 = vrot.slane %v231_v58, 2  ;;  %v525_v44 = vrot.slane %v1393_v17, 2 }
  0x39   : > { %1305 = vmatmul.msk.bf16.gmra.mxu2 %vm350_vm2, %v1859_v13  ;;  %v526_v52 = vrot.slane %v1394_v21, 2  ;;  %v528_v53 = vrot.slane %v234_v22, 2  ;;  %v530_v17 = vrot.slane %v235_v59, 2  ;;  %v531_v18 = vrot.slane %v236_v60, 2 }
  0x3a   : > { %v522_v29 = vsel %vm504_vm3, %v520_v62, %v521_v63  ;;  %v524_v30 = vsel %vm504_vm3, %v521_v63, %v523_v2  ;;  %v533_v21 = vrot.slane %v237_v0, 2  ;;  %v535_v54 = vrot.slane %v1397_v23, 2 }
  0x3b   : > { %1307 = vmatmul.msk.bf16.gmra.mxu3 %vm350_vm2, %v1863_v28  ;;  %v1914_v36 = vpack.c.bf16 %v524_v30, %v522_v29  ;;  %v527_v58 = vsel %vm504_vm3, %v525_v44, %v526_v52  ;;  %v532_v22 = vsel %vm504_vm3, %v530_v17, %v531_v18  ;;  %v536_v59 = vrot.slane %v1398_v24, 2  ;;  %v1993_v24 = vld [vmem:[%s1693_s30 + $0x60] sm:$0xff]  }
  0x3c   : > { %v534_v6 = vsel %vm504_vm3, %v531_v18, %v533_v21  ;;  %v538_v60 = vrot.slane %v240_v32, 2  ;;  %v1996_v32 = vld [vmem:[%s1693_s30 + $0x68] sm:$0x1]  ;;  %v540_v35 = vrot.slane %v241_v7, 2  ;;  %v541_v41 = vrot.slane %v242_v8, 2 }
  0x3d   : > { %v1962_v12 = vpack.c.bf16 %v534_v6, %v532_v22  ;;  %v537_v0 = vsel %vm504_vm3, %v535_v54, %v536_v59  ;;  %v2266_v42 = vunpack.c.l.bf16 %v1807_v1  ;;  %v1401_v46 = vunpack.c.l.bf16 %v1993_v24 }
  0x3e   : > { %1301 = vmatmul.msk.bf16.gmra.mxu0 %vm350_vm2, %v341_v33  ;;  %v539_v26 = vsel %vm504_vm3, %v536_v59, %v538_v60  ;;  %v246_v51 = vunpack.c.l.bf16 %v1996_v32  ;;  %v542_v56 = vsel %vm504_vm3, %v540_v35, %v541_v41 }
  0x3f   : > { %v1982_v37 = vpack.c.bf16 %v539_v26, %v537_v0  ;;  %v543_v43 = vrot.slane %v2266_v42, 2  ;;  %v740_v7 = vrot.slane %v1401_v46, 1 }
  0x40   : > { %v743_v1 = vrot.slane %v246_v51, 1 }
  0x41   : > { %v544_v38 = vsel %vm504_vm3, %v541_v41, %v543_v43 }
  0x48   : > { %1308 = vmatmul.msk.bf16.vlgmr.msrb.gmra.mxu1 %vm350_vm2, %v1732_v25  ;;  %v514_v25 = vsel %vm504_vm3, %v511_v15, %v513_v10  ;;  %v2025_v15 = vpack.c.bf16 %v544_v38, %v542_v56 }
  0x49   : > { %1317 = vmatmul.msk.bf16.vlgmr.msrb.gmra.mxu2 %vm350_vm2, %v561_v50  ;;  %v1900_v57 = vpack.c.bf16 %v514_v25, %v512_v16  ;;  %v1402_v50 = vunpack.c.h.bf16 %v1993_v24 }
  0x4b   : > { %1326 = vmatmul.msk.bf16.vlgmr.msrb.gmra.mxu3 %vm350_vm2, %v1812_v4  ;;  %v741_v8 = vrot.slane %v1402_v50, 1 }
  0x4d   : > { %v742_v16 = vsel %vm283_vm1, %v740_v7, %v741_v8  ;;  %v744_v25 = vsel %vm283_vm1, %v741_v8, %v743_v1 }
  0x4e   : > { %1335 = vmatmul.msk.bf16.vlgmr.msrb.gmra.mxu0 %vm350_vm2, %v341_v33  ;;  %v2035_v62 = vpack.c.bf16 %v744_v25, %v742_v16 }
  0x58   : > { %1309 = vmatmul.msk.bf16.gmra.mxu1 %vm350_vm2, %v1812_v4  ;;  %v529_v4 = vsel %vm504_vm3, %v526_v52, %v528_v53 }
  0x59   : > { %1318 = vmatmul.msk.bf16.gmra.mxu2 %vm350_vm2, %v1900_v57  ;;  %v1944_v5 = vpack.c.bf16 %v529_v4, %v527_v58 }
  0x5b   : > { %1327 = vmatmul.msk.bf16.gmra.mxu3 %vm350_vm2, %v1704_v9 }
  0x5e   : > { %1336 = vmatmul.msk.bf16.gmra.mxu0 %vm350_vm2, %v1760_v40 }
  0x68   : > { %1310 = vmatmul.msk.bf16.gmra.mxu1 %vm350_vm2, %v1704_v9 }
  0x69   : > { %1319 = vmatmul.msk.bf16.gmra.mxu2 %vm350_vm2, %v1893_v48 }
  0x6b   : > { %1328 = vmatmul.msk.bf16.gmra.mxu3 %vm350_vm2, %v1758_v39 }
  0x6e   : > { %1337 = vmatmul.msk.bf16.gmra.mxu0 %vm350_vm2, %v1854_v3 }
  0x78   : > { %1311 = vmatmul.msk.bf16.gmra.mxu1 %vm350_vm2, %v1758_v39 }
  0x79   : > { %1320 = vmatmul.msk.bf16.gmra.mxu2 %vm350_vm2, %v1914_v36 }
  0x7b   : > { %1329 = vmatmul.msk.bf16.gmra.mxu3 %vm350_vm2, %v1710_v11 }
  0x7e   : > { %1338 = vmatmul.msk.bf16.gmra.mxu0 %vm350_vm2, %v1769_v45 }
  0x88   : > { %1312 = vmatmul.msk.bf16.gmra.mxu1 %vm350_vm2, %v1710_v11 }
  0x89   : > { %1321 = vmatmul.msk.bf16.gmra.mxu2 %vm350_vm2, %v1944_v5 }
  0x8b   : > { %1330 = vmatmul.msk.bf16.gmra.mxu3 %vm350_vm2, %v1775_v49 }
  0x8e   : > { %1339 = vmatmul.msk.bf16.gmra.mxu0 %vm350_vm2, %v1859_v13 }
  0x98   : > { %1313 = vmatmul.msk.bf16.gmra.mxu1 %vm350_vm2, %v1775_v49 }
  0x99   : > { %1322 = vmatmul.msk.bf16.gmra.mxu2 %vm350_vm2, %v1962_v12 }
  0x9b   : > { %1331 = vmatmul.msk.bf16.gmra.mxu3 %vm350_vm2, %v1722_v19 }
  0x9e   : > { %1340 = vmatmul.msk.bf16.gmra.mxu0 %vm350_vm2, %v1789_v55 }
  0xa5   : > { %v1980_v27 = vpop.f32.mrf.mxu1 }
  0xa8   : > { %1314 = vmatmul.msk.bf16.gmra.mxu1 %vm350_vm2, %v1722_v19 }
  0xa9   : > { %1323 = vmatmul.msk.bf16.gmra.mxu2 %vm350_vm2, %v1982_v37 }
  0xab   : > { %v388_v23 = vpop.f32.mrf.mxu0  ;;  %1332 = vmatmul.msk.bf16.gmra.mxu3 %vm350_vm2, %v1799_v61 }
  0xac   : > { %v1990_v20 = vpop.f32.mrf.mxu2 }
  0xad   : > { %v1998_v31 = vpop.f32.mrf.mxu1 }
  0xae   : > { %1341 = vmatmul.msk.bf16.gmra.mxu0 %vm350_vm2, %v1863_v28  ;;  %v2002_v33 = vpop.f32.mrf.mxu3 }
  0xb3   : > { %v390_v34 = vpop.f32.mrf.mxu0 }
  0xb4   : > { %v2021_v47 = vpop.f32.mrf.mxu2 }
  0xb5   : > { %v2023_v14 = vpop.f32.mrf.mxu1 }
  0xb6   : > { %v2027_v10 = vpop.f32.mrf.mxu3 }
  0xb8   : > { %1315 = vmatmul.msk.bf16.gmra.mxu1 %vm350_vm2, %v1799_v61 }
  0xb9   : > { %1324 = vmatmul.msk.bf16.gmra.mxu2 %vm350_vm2, %v2025_v15 }
  0xbb   : > { %v393_v63 = vpop.f32.mrf.mxu0  ;;  %1333 = vmatmul.msk.bf16.gmra.mxu3 %vm350_vm2, %v1993_v24 }
  0xbc   : > { %v2039_v2 = vpop.f32.mrf.mxu2 }
  0xbd   : > { %v2041_v29 = vpop.f32.mrf.mxu1 }
  0xbe   : > { %1342 = vmatmul.msk.bf16.gmra.mxu0 %vm350_vm2, %v2035_v62  ;;  %v2045_v30 = vpop.f32.mrf.mxu3 }
  0xc3   : > { %v395_v44 = vpop.f32.mrf.mxu0 }
  0xc4   : > { %v2047_v52 = vpop.f32.mrf.mxu2 }
  0xc5   : > { %v464_v53 = vpop.f32.mrf.mxu1 }
  0xc6   : > { %v2049_v58 = vpop.f32.mrf.mxu3  ;;  %v465_v4 = vadd.f32 %v464_v53, %v388_v23 }
  0xc8   : > { %1344 = vmatmul.msk.bf16.vlgmr.msra.gmra.mxu1 %vm350_vm2, %v1900_v57 }
  0xc9   : > { %1353 = vmatmul.msk.bf16.vlgmr.msra.gmra.mxu2 %vm350_vm2, %v1704_v9 }
  0xcb   : > { %v765_v17 = vpop.f32.mrf.mxu0  ;;  %1362 = vmatmul.msk.bf16.vlgmr.msra.gmra.mxu3 %vm350_vm2, %v1760_v40 }
  0xcc   : > { %v607_v18 = vpop.f32.mrf.mxu2 }
  0xcd   : > { %v647_v21 = vadd.f32 %v607_v18, %v465_v4  ;;  %v466_v22 = vpop.f32.mrf.mxu1 }
  0xce   : > { %1371 = vmatmul.msk.bf16.vlgmr.msra.gmra.mxu0 %vm350_vm2, %v1893_v48  ;;  %v681_v6 = vpop.f32.mrf.mxu3  ;;  %v467_v54 = vadd.f32 %v466_v22, %v390_v34 }
  0xcf   : > { %v721_v59 = vadd.f32 %v681_v6, %v647_v21 }
  0xd1   : > { %v2059_v60 = vadd.f32 %v765_v17, %v721_v59 }
  0xd3   : > { %v767_v0 = vpop.f32.mrf.mxu0 }
  0xd4   : > { %v609_v57 = vpop.f32.mrf.mxu2 }
  0xd5   : > { %v648_v26 = vadd.f32 %v609_v57, %v467_v54  ;;  %v469_v23 = vpop.f32.mrf.mxu1 }
  0xd6   : > { %v683_v9 = vpop.f32.mrf.mxu3  ;;  %v470_v35 = vadd.f32 %v469_v23, %v393_v63 }
  0xd7   : > { %v722_v41 = vadd.f32 %v683_v9, %v648_v26 }
  0xd8   : > { %1345 = vmatmul.msk.bf16.gmra.mxu1 %vm350_vm2, %v1893_v48 }
  0xd9   : > { %1354 = vmatmul.msk.bf16.gmra.mxu2 %vm350_vm2, %v1758_v39  ;;  %v2065_v40 = vadd.f32 %v767_v0, %v722_v41 }
  0xdb   : > { %v770_v42 = vpop.f32.mrf.mxu0  ;;  %1363 = vmatmul.msk.bf16.gmra.mxu3 %vm350_vm2, %v1854_v3 }
  0xdc   : > { %v612_v43 = vpop.f32.mrf.mxu2 }
  0xdd   : > { %v649_v56 = vadd.f32 %v612_v43, %v470_v35  ;;  %v471_v38 = vpop.f32.mrf.mxu1 }
  0xde   : > { %1372 = vmatmul.msk.bf16.gmra.mxu0 %vm350_vm2, %v1914_v36  ;;  %v686_v34 = vpop.f32.mrf.mxu3  ;;  %v472_v7 = vadd.f32 %v471_v38, %v395_v44 }
  0xdf   : > { %v723_v8 = vadd.f32 %v686_v34, %v649_v56 }
  0xe1   : > { %v2071_v1 = vadd.f32 %v770_v42, %v723_v8  ;;  %v822_v8 = vrot.slane %v1402_v50, 2 }
  0xe3   : > { %v772_v48 = vpop.f32.mrf.mxu0 }
  0xe4   : > { %v614_v16 = vpop.f32.mrf.mxu2 }
  0xe5   : > { %v650_v39 = vadd.f32 %v614_v16, %v472_v7  ;;  %v474_v25 = vpop.f32.mrf.mxu1 }
  0xe6   : > { %v688_v63 = vpop.f32.mrf.mxu3  ;;  %v475_v53 = vadd.f32 %v474_v25, %v1980_v27 }
  0xe7   : > { %v724_v4 = vadd.f32 %v688_v63, %v650_v39 }
  0xe8   : > { %1346 = vmatmul.msk.bf16.gmra.mxu1 %vm350_vm2, %v1914_v36 }
  0xe9   : > { %1355 = vmatmul.msk.bf16.gmra.mxu2 %vm350_vm2, %v1710_v11  ;;  %v2078_v3 = vadd.f32 %v772_v48, %v724_v4 }
  0xeb   : > { %v775_v44 = vpop.f32.mrf.mxu0  ;;  %1364 = vmatmul.msk.bf16.gmra.mxu3 %vm350_vm2, %v1769_v45 }
  0xec   : > { %v617_v17 = vpop.f32.mrf.mxu2 }
  0xed   : > { %v651_v18 = vadd.f32 %v617_v17, %v475_v53  ;;  %v476_v21 = vpop.f32.mrf.mxu1 }
  0xee   : > { %1373 = vmatmul.msk.bf16.gmra.mxu0 %vm350_vm2, %v1944_v5  ;;  %v691_v27 = vpop.f32.mrf.mxu3  ;;  %v477_v22 = vadd.f32 %v476_v21, %v1998_v31 }
  0xef   : > { %v725_v6 = vadd.f32 %v691_v27, %v651_v18 }
  0xf1   : > { %v2085_v36 = vadd.f32 %v775_v44, %v725_v6 }
  0xf3   : > { %v777_v54 = vpop.f32.mrf.mxu0 }
  0xf4   : > { %v619_v11 = vpop.f32.mrf.mxu2 }
  0xf5   : > { %v652_v59 = vadd.f32 %v619_v11, %v477_v22  ;;  %v479_v0 = vpop.f32.mrf.mxu1 }
  0xf6   : > { %v693_v57 = vpop.f32.mrf.mxu3  ;;  %v480_v26 = vadd.f32 %v479_v0, %v2023_v14 }
  0xf7   : > { %v726_v45 = vadd.f32 %v693_v57, %v652_v59 }
  0xf8   : > { %1347 = vmatmul.msk.bf16.gmra.mxu1 %vm350_vm2, %v1944_v5 }
  0xf9   : > { %1356 = vmatmul.msk.bf16.gmra.mxu2 %vm350_vm2, %v1775_v49  ;;  %v2092_v23 = vadd.f32 %v777_v54, %v726_v45 }
  0xfb   : > { %v780_v31 = vpop.f32.mrf.mxu0  ;;  %1365 = vmatmul.msk.bf16.gmra.mxu3 %vm350_vm2, %v1859_v13  ;;  %v821_v13 = vrot.slane %v1401_v46, 2 }
  0xfc   : > { %v622_v9 = vpop.f32.mrf.mxu2 }
  0xfd   : > { %v653_v35 = vadd.f32 %v622_v9, %v480_v26  ;;  %v481_v41 = vpop.f32.mrf.mxu1  ;;  %v823_v46 = vsel %vm504_vm3, %v821_v13, %v822_v8 }
  0xfe   : > { %1374 = vmatmul.msk.bf16.gmra.mxu0 %vm350_vm2, %v1962_v12  ;;  %v696_v14 = vpop.f32.mrf.mxu3  ;;  %v482_v42 = vadd.f32 %v481_v41, %v2041_v29  ;;  %v824_v29 = vrot.slane %v246_v51, 2  ;;  %v219_v41 = vld [vmem:[%s1693_s30 + $0x74] sm:$0x1] }
  0xff   : > { %v727_v43 = vadd.f32 %v696_v14, %v653_v35  ;;  %v217_v35 = vld [vmem:[%s1693_s30 + $0x6c] sm:$0xff]  }
 0x100   : > { %v825_v50 = vsel %vm504_vm3, %v822_v8, %v824_v29 }
 0x101   : > { %v2099_v5 = vadd.f32 %v780_v31, %v727_v43 }
 0x103   : > { %v782_v56 = vpop.f32.mrf.mxu0 }
 0x104   : > { %v624_v49 = vpop.f32.mrf.mxu2 }
 0x105   : > { %v654_v38 = vadd.f32 %v624_v49, %v482_v42  ;;  %v484_v34 = vpop.f32.mrf.mxu1  ;;  %v248_v49 = vunpack.c.h.bf16 %v217_v35 }
 0x106   : > { %v698_v7 = vpop.f32.mrf.mxu3  ;;  %v485_v39 = vadd.f32 %v484_v34, %v1990_v20 }
 0x107   : > { %v728_v48 = vadd.f32 %v698_v7, %v654_v38  ;;  %v249_v38 = vunpack.c.l.bf16 %v219_v41  ;;  %v980_v8 = vrot.slane %v248_v49, 1 }
 0x108   : > { %1348 = vmatmul.msk.bf16.gmra.mxu1 %vm350_vm2, %v1962_v12  ;;  %v2118_v12 = vpack.c.bf16 %v825_v50, %v823_v46 }
 0x109   : > { %1357 = vmatmul.msk.bf16.gmra.mxu2 %vm350_vm2, %v1722_v19  ;;  %v2111_v16 = vadd.f32 %v782_v56, %v728_v48  ;;  %v247_v56 = vunpack.c.l.bf16 %v217_v35  ;;  %v982_v48 = vrot.slane %v249_v38, 1  ;;  %v1063_v46 = vrot.slane %v249_v38, 2 }
 0x10b   : > { %v785_v25 = vpop.f32.mrf.mxu0  ;;  %1366 = vmatmul.msk.bf16.gmra.mxu3 %vm350_vm2, %v1789_v55  ;;  %v979_v13 = vrot.slane %v247_v56, 1 }
 0x10c   : > { %v627_v63 = vpop.f32.mrf.mxu2 }
 0x10d   : > { %v655_v53 = vadd.f32 %v627_v63, %v485_v39  ;;  %v486_v19 = vpop.f32.mrf.mxu1  ;;  %v981_v63 = vsel %vm283_vm1, %v979_v13, %v980_v8 }
 0x10e   : > { %1375 = vmatmul.msk.bf16.gmra.mxu0 %vm350_vm2, %v1982_v37  ;;  %v701_v32 = vpop.f32.mrf.mxu3  ;;  %v487_v20 = vadd.f32 %v486_v19, %v2021_v47 }
 0x10f   : > { %v729_v51 = vadd.f32 %v701_v32, %v655_v53  ;;  %v983_v53 = vsel %vm283_vm1, %v980_v8, %v982_v48 }
 0x111   : > { %v2122_v4 = vadd.f32 %v785_v25, %v729_v51  ;;  %v1061_v25 = vrot.slane %v248_v49, 2 }
 0x113   : > { %v787_v44 = vpop.f32.mrf.mxu0 }
 0x114   : > { %v629_v55 = vpop.f32.mrf.mxu2 }
 0x115   : > { %v656_v17 = vadd.f32 %v629_v55, %v487_v20  ;;  %v489_v18 = vpop.f32.mrf.mxu1 }
 0x116   : > { %v703_v21 = vpop.f32.mrf.mxu3  ;;  %v490_v6 = vadd.f32 %v489_v18, %v2039_v2 }
 0x117   : > { %v730_v27 = vadd.f32 %v703_v21, %v656_v17  ;;  %v1064_v17 = vsel %vm504_vm3, %v1061_v25, %v1063_v46 }
 0x118   : > { %1349 = vmatmul.msk.bf16.gmra.mxu1 %vm350_vm2, %v1982_v37 }
 0x119   : > { %1358 = vmatmul.msk.bf16.gmra.mxu2 %vm350_vm2, %v1799_v61  ;;  %v2129_v22 = vadd.f32 %v787_v44, %v730_v27  ;;  %v986_v44 = vpack.c.bf16 %v983_v53, %v981_v63 }
 0x11b   : > { %v790_v54 = vpop.f32.mrf.mxu0  ;;  %1367 = vmatmul.msk.bf16.gmra.mxu3 %vm350_vm2, %v1863_v28 }
 0x11c   : > { %v632_v47 = vpop.f32.mrf.mxu2 }
 0x11d   : > { %v657_v11 = vadd.f32 %v632_v47, %v490_v6  ;;  %v491_v59 = vpop.f32.mrf.mxu1 }
 0x11e   : > { %1376 = vmatmul.msk.bf16.gmra.mxu0 %vm350_vm2, %v2025_v15  ;;  %v706_v37 = vpop.f32.mrf.mxu3  ;;  %v492_v61 = vadd.f32 %v491_v59, %v2047_v52 }
 0x11f   : > { %v731_v0 = vadd.f32 %v706_v37, %v657_v11 }
 0x121   : > { %v2136_v57 = vadd.f32 %v790_v54, %v731_v0 }
 0x123   : > { %v792_v26 = vpop.f32.mrf.mxu0 }
 0x124   : > { %v634_v2 = vpop.f32.mrf.mxu2 }
 0x125   : > { %v658_v45 = vadd.f32 %v634_v2, %v492_v61  ;;  %v494_v31 = vpop.f32.mrf.mxu1 }
 0x126   : > { %v708_v9 = vpop.f32.mrf.mxu3  ;;  %v495_v42 = vadd.f32 %v494_v31, %v2002_v33 }
 0x127   : > { %v732_v28 = vadd.f32 %v708_v9, %v658_v45 }
 0x128   : > { %1350 = vmatmul.msk.bf16.gmra.mxu1 %vm350_vm2, %v2025_v15 }
 0x129   : > { %1359 = vmatmul.msk.bf16.gmra.mxu2 %vm350_vm2, %v1993_v24  ;;  %v2145_v14 = vadd.f32 %v792_v26, %v732_v28 }
 0x12b   : > { %v795_v43 = vpop.f32.mrf.mxu0  ;;  %1368 = vmatmul.msk.bf16.gmra.mxu3 %vm350_vm2, %v2035_v62  ;;  %v1060_v62 = vrot.slane %v247_v56, 2 }
 0x12c   : > { %v637_v52 = vpop.f32.mrf.mxu2 }
 0x12d   : > { %v659_v34 = vadd.f32 %v637_v52, %v495_v42  ;;  %v496_v7 = vpop.f32.mrf.mxu1  ;;  %v1062_v55 = vsel %vm504_vm3, %v1060_v62, %v1061_v25 }
 0x12e   : > { %1377 = vmatmul.msk.bf16.gmra.mxu0 %vm350_vm2, %v2118_v12  ;;  %v711_v24 = vpop.f32.mrf.mxu3  ;;  %v497_v33 = vadd.f32 %v496_v7, %v2027_v10  ;;  %v1067_v18 = vpack.c.bf16 %v1064_v17, %v1062_v55 }
 0x12f   : > { %v733_v15 = vadd.f32 %v711_v24, %v659_v34  ;;  %v2177_v34 = vld [vmem:[%s2261_s2] ss:$0 sm:$0xff] }
 0x131   : > { %v2152_v29 = vadd.f32 %v795_v43, %v733_v15 }
 0x133   : > { %v797_v39 = vpop.f32.mrf.mxu0 }
 0x134   : > { %v639_v50 = vpop.f32.mrf.mxu2 }
 0x135   : > { %v660_v19 = vadd.f32 %v639_v50, %v497_v33  ;;  %v499_v32 = vpop.f32.mrf.mxu1 }
 0x136   : > { %v713_v51 = vpop.f32.mrf.mxu3  ;;  %v500_v21 = vadd.f32 %v499_v32, %v2045_v30 }
 0x137   : > { %v734_v20 = vadd.f32 %v713_v51, %v660_v19 }
 0x138   : > { %1351 = vmatmul.msk.bf16.gmra.mxu1 %vm350_vm2, %v2118_v12 }
 0x139   : > { %1360 = vmatmul.msk.bf16.gmra.mxu2 %vm350_vm2, %v217_v35  ;;  %v2162_v10 = vadd.f32 %v797_v39, %v734_v20 }
 0x13b   : > { %v800_v27 = vpop.f32.mrf.mxu0  ;;  %1369 = vmatmul.msk.bf16.gmra.mxu3 %vm350_vm2, %v986_v44 }
 0x13c   : > { %v642_v6 = vpop.f32.mrf.mxu2 }
 0x13d   : > { %v661_v54 = vadd.f32 %v642_v6, %v500_v21  ;;  %v501_v47 = vpop.f32.mrf.mxu1 }
 0x13e   : > { %1378 = vmatmul.msk.bf16.gmra.mxu0 %vm350_vm2, %v1067_v18  ;;  %v716_v11 = vpop.f32.mrf.mxu3  ;;  %v502_v12 = vadd.f32 %v501_v47, %v2049_v58 }
 0x13f   : > { %v735_v59 = vadd.f32 %v716_v11, %v661_v54 }
 0x141   : > { %v2167_v37 = vadd.f32 %v800_v27, %v735_v59 }
 0x143   : > { %v802_v0 = vpop.f32.mrf.mxu0 }
 0x144   : > { %v644_v61 = vpop.f32.mrf.mxu2 }
 0x145   : > { %v662_v26 = vadd.f32 %v644_v61, %v502_v12  ;;  %v846_v2 = vpop.f32.mrf.mxu1 }
 0x146   : > { %v718_v45 = vpop.f32.mrf.mxu3  ;;  %v886_v30 = vadd.f32 %v846_v2, %v2059_v60 }
 0x147   : > { %v736_v31 = vadd.f32 %v718_v45, %v662_v26 }
 0x149   : > { %v2171_v9 = vadd.f32 %v802_v0, %v736_v31 }
 0x14b   : > { %v1085_v28 = vpop.f32.mrf.mxu0 }
 0x14c   : > { %v920_v35 = vpop.f32.mrf.mxu2 }
 0x14d   : > { %v960_v41 = vadd.f32 %v920_v35, %v886_v30  ;;  %v848_v42 = vpop.f32.mrf.mxu1 }
 0x14e   : > { %v1004_v43 = vpop.f32.mrf.mxu3  ;;  %v887_v52 = vadd.f32 %v848_v42, %v2065_v40 }
 0x14f   : > { %v1044_v56 = vadd.f32 %v1004_v43, %v960_v41 }
 0x151   : > { %v1125_v49 = vadd.f32 %v1085_v28, %v1044_v56 }
 0x153   : > { %v1087_v58 = vpop.f32.mrf.mxu0  ;;  %v1145_v8 = vadd.f32 %v2177_v34, %v1125_v49 }
 0x154   : > { %v922_v38 = vpop.f32.mrf.mxu2 }
 0x155   : > { %v961_v60 = vadd.f32 %v922_v38, %v887_v52  ;;  %v851_v7 = vpop.f32.mrf.mxu1  ;;  %v1161_v62 = vmax.f32 %v1145_v8, 0.0 }
 0x156   : > { %v1006_v24 = vpop.f32.mrf.mxu3  ;;  %v888_v15 = vadd.f32 %v851_v7, %v2071_v1 }
 0x157   : > { %v1045_v13 = vadd.f32 %v1006_v24, %v961_v60 }
 0x159   : > { %v1126_v48 = vadd.f32 %v1087_v58, %v1045_v13 }
 0x15b   : > { %v1146_v40 = vadd.f32 %v2177_v34, %v1126_v48  ;;  %v1090_v33 = vpop.f32.mrf.mxu0 }
 0x15c   : > { %v925_v39 = vpop.f32.mrf.mxu2 }
 0x15d   : > { %v1162_v25 = vmax.f32 %v1146_v40, 0.0  ;;  %v962_v46 = vadd.f32 %v925_v39, %v888_v15  ;;  %v853_v50 = vpop.f32.mrf.mxu1 }
 0x15e   : > { %v1009_v63 = vpop.f32.mrf.mxu3  ;;  %v889_v53 = vadd.f32 %v853_v50, %v2078_v3 }
 0x15f   : > { %v1178_v19 = vadd.f32 %v1162_v25, %v1161_v62  ;;  %v1046_v32 = vadd.f32 %v1009_v63, %v962_v46 }
 0x161   : > { %v1127_v51 = vadd.f32 %v1090_v33, %v1046_v32 }
 0x163   : > { %v1147_v1 = vadd.f32 %v2177_v34, %v1127_v51  ;;  %v1092_v20 = vpop.f32.mrf.mxu0 }
 0x164   : > { %v927_v44 = vpop.f32.mrf.mxu2 }
 0x165   : > { %v1163_v55 = vmax.f32 %v1147_v1, 0.0  ;;  %v963_v17 = vadd.f32 %v927_v44, %v889_v53  ;;  %v856_v18 = vpop.f32.mrf.mxu1 }
 0x166   : > { %v1011_v21 = vpop.f32.mrf.mxu3  ;;  %v890_v27 = vadd.f32 %v856_v18, %v2085_v36 }
 0x167   : > { %v1179_v6 = vadd.f32 %v1178_v19, %v1163_v55  ;;  %v1047_v54 = vadd.f32 %v1011_v21, %v963_v17 }
 0x169   : > { %v1128_v47 = vadd.f32 %v1092_v20, %v1047_v54 }
 0x16b   : > { %v1148_v11 = vadd.f32 %v2177_v34, %v1128_v47  ;;  %v1095_v59 = vpop.f32.mrf.mxu0 }
 0x16c   : > { %v930_v3 = vpop.f32.mrf.mxu2 }
 0x16d   : > { %v1164_v12 = vmax.f32 %v1148_v11, 0.0  ;;  %v964_v0 = vadd.f32 %v930_v3, %v890_v27  ;;  %v858_v61 = vpop.f32.mrf.mxu1 }
 0x16e   : > { %v1014_v26 = vpop.f32.mrf.mxu3  ;;  %v891_v28 = vadd.f32 %v858_v61, %v2092_v23 }
 0x16f   : > { %v1180_v2 = vadd.f32 %v1179_v6, %v1164_v12  ;;  %v1048_v45 = vadd.f32 %v1014_v26, %v964_v0 }
 0x171   : > { %v1129_v30 = vadd.f32 %v1095_v59, %v1048_v45 }
 0x173   : > { %v1149_v31 = vadd.f32 %v2177_v34, %v1129_v30  ;;  %v1097_v35 = vpop.f32.mrf.mxu0 }
 0x174   : > { %v932_v36 = vpop.f32.mrf.mxu2 }
 0x175   : > { %v1165_v41 = vmax.f32 %v1149_v31, 0.0  ;;  %v965_v42 = vadd.f32 %v932_v36, %v891_v28  ;;  %v861_v43 = vpop.f32.mrf.mxu1 }
 0x176   : > { %v1016_v52 = vpop.f32.mrf.mxu3  ;;  %v892_v60 = vadd.f32 %v861_v43, %v2099_v5 }
 0x177   : > { %v1181_v56 = vadd.f32 %v1180_v2, %v1165_v41  ;;  %v1049_v49 = vadd.f32 %v1016_v52, %v965_v42 }
 0x179   : > { %v1130_v58 = vadd.f32 %v1097_v35, %v1049_v49 }
 0x17b   : > { %v1150_v38 = vadd.f32 %v2177_v34, %v1130_v58  ;;  %v1100_v7 = vpop.f32.mrf.mxu0 }
 0x17c   : > { %v935_v24 = vpop.f32.mrf.mxu2 }
 0x17d   : > { %v1166_v15 = vmax.f32 %v1150_v38, 0.0  ;;  %v966_v13 = vadd.f32 %v935_v24, %v892_v60  ;;  %v863_v8 = vpop.f32.mrf.mxu1 }
 0x17e   : > { %v1019_v48 = vpop.f32.mrf.mxu3  ;;  %v893_v62 = vadd.f32 %v863_v8, %v2111_v16 }
 0x17f   : > { %v1182_v23 = vadd.f32 %v1181_v56, %v1166_v15  ;;  %v1050_v40 = vadd.f32 %v1019_v48, %v966_v13 }
 0x181   : > { %v1131_v33 = vadd.f32 %v1100_v7, %v1050_v40 }
 0x183   : > { %v1151_v39 = vadd.f32 %v2177_v34, %v1131_v33  ;;  %v1102_v25 = vpop.f32.mrf.mxu0 }
 0x184   : > { %v937_v46 = vpop.f32.mrf.mxu2 }
 0x185   : > { %v1167_v50 = vmax.f32 %v1151_v39, 0.0  ;;  %v967_v63 = vadd.f32 %v937_v46, %v893_v62  ;;  %v866_v53 = vpop.f32.mrf.mxu1 }
 0x186   : > { %v1021_v19 = vpop.f32.mrf.mxu3  ;;  %v894_v20 = vadd.f32 %v866_v53, %v2122_v4 }
 0x187   : > { %v1183_v5 = vadd.f32 %v1182_v23, %v1167_v50  ;;  %v1051_v32 = vadd.f32 %v1021_v19, %v967_v63 }
 0x189   : > { %v1132_v51 = vadd.f32 %v1102_v25, %v1051_v32 }
 0x18b   : > { %v1152_v1 = vadd.f32 %v2177_v34, %v1132_v51  ;;  %v1105_v44 = vpop.f32.mrf.mxu0 }
 0x18c   : > { %v940_v55 = vpop.f32.mrf.mxu2 }
 0x18d   : > { %v1168_v17 = vmax.f32 %v1152_v1, 0.0  ;;  %v968_v18 = vadd.f32 %v940_v55, %v894_v20  ;;  %v868_v21 = vpop.f32.mrf.mxu1 }
 0x18e   : > { %v1024_v27 = vpop.f32.mrf.mxu3  ;;  %v895_v11 = vadd.f32 %v868_v21, %v2129_v22 }
 0x18f   : > { %v1184_v16 = vadd.f32 %v1183_v5, %v1168_v17  ;;  %v1052_v6 = vadd.f32 %v1024_v27, %v968_v18 }
 0x191   : > { %v1133_v54 = vadd.f32 %v1105_v44, %v1052_v6 }
 0x193   : > { %v1153_v47 = vadd.f32 %v2177_v34, %v1133_v54  ;;  %v1107_v59 = vpop.f32.mrf.mxu0 }
 0x194   : > { %v942_v3 = vpop.f32.mrf.mxu2 }
 0x195   : > { %v1169_v12 = vmax.f32 %v1153_v47, 0.0  ;;  %v969_v0 = vadd.f32 %v942_v3, %v895_v11  ;;  %v871_v61 = vpop.f32.mrf.mxu1 }
 0x196   : > { %v1026_v26 = vpop.f32.mrf.mxu3  ;;  %v896_v31 = vadd.f32 %v871_v61, %v2136_v57 }
 0x197   : > { %v1185_v4 = vadd.f32 %v1184_v16, %v1169_v12  ;;  %v1053_v2 = vadd.f32 %v1026_v26, %v969_v0 }
 0x199   : > { %v1134_v45 = vadd.f32 %v1107_v59, %v1053_v2 }
 0x19b   : > { %v1154_v30 = vadd.f32 %v2177_v34, %v1134_v45  ;;  %v1110_v28 = vpop.f32.mrf.mxu0 }
 0x19c   : > { %v945_v35 = vpop.f32.mrf.mxu2 }
 0x19d   : > { %v1170_v36 = vmax.f32 %v1154_v30, 0.0  ;;  %v970_v41 = vadd.f32 %v945_v35, %v896_v31  ;;  %v873_v42 = vpop.f32.mrf.mxu1 }
 0x19e   : > { %v1029_v43 = vpop.f32.mrf.mxu3  ;;  %v897_v58 = vadd.f32 %v873_v42, %v2145_v14 }
 0x19f   : > { %v1186_v22 = vadd.f32 %v1185_v4, %v1170_v36  ;;  %v1054_v52 = vadd.f32 %v1029_v43, %v970_v41 }
 0x1a1   : > { %v1135_v56 = vadd.f32 %v1110_v28, %v1054_v52 }
 0x1a3   : > { %v1155_v49 = vadd.f32 %v2177_v34, %v1135_v56  ;;  %v1112_v38 = vpop.f32.mrf.mxu0 }
 0x1a4   : > { %v947_v60 = vpop.f32.mrf.mxu2 }
 0x1a5   : > { %v1171_v7 = vmax.f32 %v1155_v49, 0.0  ;;  %v971_v24 = vadd.f32 %v947_v60, %v897_v58  ;;  %v876_v15 = vpop.f32.mrf.mxu1 }
 0x1a6   : > { %v1031_v13 = vpop.f32.mrf.mxu3  ;;  %v898_v40 = vadd.f32 %v876_v15, %v2152_v29 }
 0x1a7   : > { %v1187_v57 = vadd.f32 %v1186_v22, %v1171_v7  ;;  %v1055_v8 = vadd.f32 %v1031_v13, %v971_v24 }
 0x1a9   : > { %v1136_v48 = vadd.f32 %v1112_v38, %v1055_v8 }
 0x1ab   : > { %v1156_v23 = vadd.f32 %v2177_v34, %v1136_v48  ;;  %v1115_v33 = vpop.f32.mrf.mxu0 }
 0x1ac   : > { %v950_v39 = vpop.f32.mrf.mxu2 }
 0x1ad   : > { %v1172_v62 = vmax.f32 %v1156_v23, 0.0  ;;  %v972_v25 = vadd.f32 %v950_v39, %v898_v40  ;;  %v878_v46 = vpop.f32.mrf.mxu1 }
 0x1ae   : > { %v1034_v50 = vpop.f32.mrf.mxu3  ;;  %v899_v5 = vadd.f32 %v878_v46, %v2162_v10 }
 0x1af   : > { %v1188_v14 = vadd.f32 %v1187_v57, %v1172_v62  ;;  %v1056_v63 = vadd.f32 %v1034_v50, %v972_v25 }
 0x1b1   : > { %v1137_v53 = vadd.f32 %v1115_v33, %v1056_v63 }
 0x1b3   : > { %v1157_v19 = vadd.f32 %v2177_v34, %v1137_v53  ;;  %v1117_v32 = vpop.f32.mrf.mxu0 }
 0x1b4   : > { %v952_v51 = vpop.f32.mrf.mxu2 }
 0x1b5   : > { %v1173_v1 = vmax.f32 %v1157_v19, 0.0  ;;  %v973_v20 = vadd.f32 %v952_v51, %v899_v5  ;;  %v881_v55 = vpop.f32.mrf.mxu1 }
 0x1b6   : > { %v1036_v44 = vpop.f32.mrf.mxu3  ;;  %v900_v27 = vadd.f32 %v881_v55, %v2167_v37 }
 0x1b7   : > { %v1189_v29 = vadd.f32 %v1188_v14, %v1173_v1  ;;  %v1057_v17 = vadd.f32 %v1036_v44, %v973_v20 }
 0x1b9   : > { %v1138_v18 = vadd.f32 %v1117_v32, %v1057_v17 }
 0x1bb   : > { %v1158_v21 = vadd.f32 %v2177_v34, %v1138_v18  ;;  %v1120_v47 = vpop.f32.mrf.mxu0 }
 0x1bc   : > { %v955_v16 = vpop.f32.mrf.mxu2 }
 0x1bd   : > { %v1174_v6 = vmax.f32 %v1158_v21, 0.0  ;;  %v974_v54 = vadd.f32 %v955_v16, %v900_v27  ;;  %v883_v3 = vpop.f32.mrf.mxu1 }
 0x1be   : > { %v1039_v11 = vpop.f32.mrf.mxu3  ;;  %v901_v61 = vadd.f32 %v883_v3, %v2171_v9  ;;  %v1177_v9 = vld [vmem:[%s1678_s8] sm:$0x1] }
 0x1bf   : > { %v1190_v59 = vadd.f32 %v1189_v29, %v1174_v6  ;;  %v1058_v10 = vadd.f32 %v1039_v11, %v974_v54 }
 0x1c1   : > { %v1139_v12 = vadd.f32 %v1120_v47, %v1058_v10 }
 0x1c3   : > { %v1159_v0 = vadd.f32 %v2177_v34, %v1139_v12  ;;  %v1122_v31 = vpop.f32.mrf.mxu0 }
 0x1c4   : > { %v957_v26 = vpop.f32.mrf.mxu2 }
 0x1c5   : > { %v1175_v4 = vmax.f32 %v1159_v0, 0.0  ;;  %v975_v2 = vadd.f32 %v957_v26, %v901_v61 }
 0x1c6   : > { %v1041_v45 = vpop.f32.mrf.mxu3 }
 0x1c7   : > { %v1191_v37 = vadd.f32 %v1190_v59, %v1175_v4  ;;  %v1059_v30 = vadd.f32 %v1041_v45, %v975_v2 }
 0x1c9   : > { %v1140_v28 = vadd.f32 %v1122_v31, %v1059_v30 }
 0x1cb   : > { %v1160_v35 = vadd.f32 %v2177_v34, %v1140_v28 }
 0x1cd   : > { %v1176_v36 = vmax.f32 %v1160_v35, 0.0 }
 0x1cf   : > { %v1192_v41 = vadd.f32 %v1191_v37, %v1176_v36 }
 0x1d1   : > { %v1193_v42 = vrot.slane %v1192_v41, 4 }
 0x1d3   : > { %v1194_v43 = vadd.f32 %v1193_v42, %v1192_v41 }
 0x1d5   : > { %v1195_v22 = vrot.slane %v1194_v43, 2 }
 0x1d7   : > { %v1196_v52 = vadd.f32 %v1195_v22, %v1194_v43 }
 0x1d9   : > { %v1197_v56 = vrot.slane %v1196_v52, 1 }
 0x1db   : > { %v1198_v49 = vadd.f32 %v1197_v56, %v1196_v52  ;;  %1204 = sbr.rel (%p1379_p0) target bundleno = 490 (0x1ea), region = 40 }
 0x1dd   : > { %v1199_v58 = vadd.f32 %v1198_v49, %v1177_v9 }
 0x1df   : > { %1200 = vst [vmem:[%s1678_s8] sm:$0x1] %v1199_v58 }
 0x1e6   : > { %v1205_v38 = vld [vmem:[%s1678_s8] sm:$0x1] }
 0x1e7   : > { %v1206_v60 = vmul.f32 0.00390625, %v1205_v38 }
 0x1e9   : > { %1207 = vst [vmem:[%s1678_s8] sm:$0x1] %v1206_v60 }
 0x1ea PF: > { %s1217_s7 = scalar_lea.hbm %s2262_s3, %s1566_s16  ;;  %s1219_s10 = sshll.u32 %s1678_s8, 4  ;;  %s1220_s10 = int_to_ptr.vmem [resolvable:$true] %s1219_s10 }
 0x1eb   : > { %s1221_s11 = sshll.u32 %s1217_s7, 4  ;;  %s1209_s15 = scalar_lea.sflag [#allocation3], %s173_s29  ;;  %s1222_s11 = int_to_ptr.hbm [resolvable:$true] %s1221_s11 }
 0x1ec   : > { %s1498_s20 = sshra.s32 %s1222_s11, 4  ;;  %s1504_s4 = scalar_lea.hbm %s2262_s3, 2  ;;  %s1499_s20 = int_to_ptr.hbm [resolvable:$true] %s1498_s20 }
 0x1ed   : > { %s1500_s21 = scalar_lea.hbm %s1499_s20, 1  ;;  %p1505_p5 = scmp.lt.s32.totalorder %s1499_s20, %s2262_s3 }
 0x1ee   : > { %p1501_p1 = scmp.ne.s32.totalorder %s1499_s20, %s1500_s21  ;;  %p1506_p6 = scmp.lt.s32.totalorder %s1504_s4, %s1500_s21 }
 0x1f0   : > { %p1502_p2 = pnand %p1501_p1, %p1650_p3  ;;  %p1507_p7 = por %p1506_p6, %p1505_p5 }
 0x1f2   : > { %p1503_p4 = pneg %p1502_p2 }
 0x1f4   : > { %p1508_p8 = pnand %p1507_p7, %p1503_p4 }
 0x1f6   : > { %1511 = shalt.err (!%p1508_p8)
}
 0x1f7   : > { %1411 = dma.vmem_to_hbm [thread:$0]  (%p1650_p3), %s1220_s10, 16, %s1222_s11, %s1209_s15  }
 0x1f8 PF: > { %p1417_p10 = scmp.ge.s32.totalorder %s1578_s19, 2  ;;  %s1233_s16 = sand.u32 1, %s1550_s12  }
 0x1f9   : > { %s1234_s29 = scalar_lea.sflag [#allocation3], %s1233_s16 }
 0x1fa   : > { %p1414_p11 = pnand %p1417_p10, %p1660_p9 }
 0x1fc   : > { %p1415_p12 = pneg %p1414_p11 }
 0x1fe   : > { %1545 = dma.done.wait (%p1415_p12), %s1234_s29, 16  }
 0x1ff   : > { %1547 = vsyncadd (%p1415_p12), %s1234_s29, 4294967280  ;;  %s16_s19 = sadd.s32 1, %s1578_s19   ;;  %s2267_s12 = smov %s1554_s13 }
 0x200   : > { %p13_p13 = scmp.ge.s32.totalorder %s16_s19, 6   ;;  %s2268_s13 = smov %s1558_s14 }
 0x201   : > { %s2269_s14 = smov %s1668_s28  ;;  %s2270_s15 = smov %s1570_s17 }
 0x202   : > { %s2271_s16 = smov %s1574_s18  ;;  %s2272_s17 = smov %s2275_s22 }
 0x203   : > { %s2273_s18 = smov %s2279_s23  ;;  %15 = sbr.rel (!%p13_p13) target bundleno = 5 (0x5), region = 84 }
 0x208   :  { %1239 = vsyncpa [#allocation3], 1 }
 0x209   :  { %1241 = vsyncpa [#allocation3 + $0x1], 1 }

</bundles_post_ra>
